<compile_context>
chip_gen: v7x
topology: tpu7x:2x2x1
jax: 0.10.0
libtpu: 0.0.40
codegen_flags: <defaults>
</compile_context>

<pallas_src>
import numpy as np
import jax
import jax.numpy as jnp
from jax.experimental import pallas as pl
from jax.experimental.pallas import tpu as pltpu


def _gauss_noise_kernel(sigma_ref, out_ref):
    # Gauss_NoiseModel.forward: exp(sigma). Single EUP transcendental pass over one vreg.
    out_ref[...] = jnp.exp(sigma_ref[...])


def gauss_noise_forward(x, sigma):
    """PyTorch: Gauss_NoiseModel.forward(x) == torch.exp(sigma); `x` is unused."""
    del x  # the module ignores its input entirely
    sigma_2d = sigma.reshape(1, -1)                       # (1, N): N on the lane axis
    vmem = pl.BlockSpec(memory_space=pltpu.MemorySpace.VMEM)
    out = pl.pallas_call(
        _gauss_noise_kernel,
        out_shape=jax.ShapeDtypeStruct(sigma_2d.shape, sigma_2d.dtype),
        in_specs=[vmem],
        out_specs=vmem,
    )(sigma_2d)
    return out.reshape(sigma.shape)


if __name__ == "__main__":
    key = jax.random.PRNGKey(0)
    k_sig, k_x = jax.random.split(key)

    # Shapes consistent with the module's use in GP_progression_model:
    # out_size = number of biomarkers; x is the (ignored) batch of observations.
    out_size = 4
    init = 1.0
    B, M = out_size, 16

    # nn.Parameter(torch.Tensor(out_size).fill_(init)) plus a small deterministic
    # perturbation (stands in for a trained sigma so the exp is actually exercised).
    sigma = jnp.float32(init) + 0.1 * jax.random.normal(k_sig, (out_size,), dtype=jnp.float32)
    x = jax.random.normal(k_x, (B, M, 1), dtype=jnp.float32)   # ignored by forward

    noise = gauss_noise_forward(x, sigma)
    noise = jax.block_until_ready(noise)

    ref = np.exp(np.asarray(sigma))
    assert noise.shape == (out_size,)
    np.testing.assert_allclose(np.asarray(noise), ref, rtol=1e-6, atol=1e-6)
    print("KERNEL_OK")
</pallas_src>

<mosaic_0001>
module attributes {stable_mosaic.version = 11 : i64} {
  func.func @_gauss_noise_kernel(%arg0: memref<1x4xf32, #tpu.memory_space<vmem>>, %arg1: memref<1x4xf32, #tpu.memory_space<vmem>>) attributes {dimension_semantics = [], scalar_prefetch = 0 : i64, scratch_operands = 0 : i64, tpu.core_type = #tpu.core_type<tc>} {
    %c0 = arith.constant 0 : index
    %c0_0 = arith.constant 0 : index
    %0 = vector.load %arg0[%c0, %c0_0] : memref<1x4xf32, #tpu.memory_space<vmem>>, vector<1x4xf32>
    %1 = math.exp %0 : vector<1x4xf32>
    %c0_1 = arith.constant 0 : index
    %c0_2 = arith.constant 0 : index
    %2 = vector.load %arg1[%c0_1, %c0_2] : memref<1x4xf32, #tpu.memory_space<vmem>>, vector<1x4xf32>
    tpu.vector_store %arg1[%c0_1, %c0_2], %1 {strides = array<i32>} : memref<1x4xf32, #tpu.memory_space<vmem>>, vector<1x4xf32>,
    return
  }
}

</mosaic_0001>

<bundles_post_ra>
// kernel: tpu_custom_call.1
= control target key start
LH: loop header
LB: loop body
LE: loop exit
PB: predicated region body
PF: predicated region fallthrough
CT: control target
= control target key end

     0   :  { %6 = vsyncpa [#allocation3], 0  ;;  %s129_s0 = inlined_call_operand.hbm [shape: f32[1,4], index: 0, kind: input, shape index: {}]   ;;  %s130_s1 = inlined_call_operand.hbm [shape: f32[1,4], index: 1, kind: output, shape index: {}]  }
   0x1   :  { %7 = vsyncpa [#allocation4], 0  ;;  %s93_s6 = smov [#allocation2]   ;;  %s45_s10 = scalar_lea.hbm %s129_s0, 16 }
   0x2   :  { %s14_s7 = sshll.u32 %s93_s6, 4  ;;  %p46_p0 = scmp.ne.s32.totalorder %s129_s0, %s45_s10  ;;  %s15_s7 = int_to_ptr.vmem [resolvable:$true] %s14_s7 }
   0x3   :  { %p49_p1 = scmp.lt.u32.totalorder %s45_s10, %s129_s0 }
   0x5   :  { %p51_p2 = pnand %p49_p1, %p46_p0 }
   0x7   :  { %54 = shalt.err (!%p51_p2)
}
   0x8   :  { %s55_s15 = scalar_lea.vmem %s15_s7, 16  ;;  %s59_s16 = scalar_lea.vmem %s15_s7, 32 }
   0x9   :  { %p56_p3 = scmp.ne.s32.totalorder %s15_s7, %s55_s15  ;;  %p60_p4 = scmp.lt.s32.totalorder %s15_s7, %s15_s7 }
   0xa   :  { %p61_p5 = scmp.lt.s32.totalorder %s59_s16, %s55_s15 }
   0xc   :  { %p62_p6 = por %p61_p5, %p60_p4 }
   0xe   :  { %p63_p7 = pnand %p62_p6, %p56_p3 }
  0x10   :  { %66 = shalt.err (!%p63_p7)
}
  0x11   :  { %17 = dma.hbm_to_vmem [thread:$0]  %s129_s0, 16, %s15_s7, [#allocation3]  }
  0x12   :  { %89 = dma.done.wait [#allocation3], 16  }
  0x13   :  { %90 = vsyncadd [#allocation3], 4294967280  ;;  %v21_v0 = vld [vmem:[#allocation2] sm:$0x1]  ;;  %s94_s19 = smov [#allocation5]   ;;  %vm24_vm0 = vcmask 24576  }
  0x14   :  { %v22_v1 = vmul.f32 1.442695, %v21_v0  ;;  %s32_s20 = sshll.u32 %s94_s19, 4  ;;  %s33_s20 = int_to_ptr.vmem [resolvable:$true] %s32_s20 }
  0x15   :  { %s67_s21 = scalar_lea.vmem %s33_s20, 16  ;;  %s71_s22 = scalar_lea.vmem %s33_s20, 32 }
  0x16   :  { %43 = vpow2.f32 %v22_v1  ;;  %p68_p8 = scmp.ne.s32.totalorder %s33_s20, %s67_s21  ;;  %p72_p9 = scmp.lt.s32.totalorder %s33_s20, %s33_s20 }
  0x17   :  { %p73_p10 = scmp.lt.s32.totalorder %s71_s22, %s67_s21 }
  0x19   :  { %p74_p11 = por %p73_p10, %p72_p9 }
  0x1b   :  { %p75_p12 = pnand %p74_p11, %p68_p8 }
  0x20   :  { %v44_v2 = vpop.eup %43 }
  0x21   :  { %25 = vst.msk [vmem:[#allocation5] sm:$0x1] %vm24_vm0, %v44_v2 }
  0x22   :  { %78 = shalt.err (!%p75_p12)
}
  0x23   :  { %s79_s24 = scalar_lea.hbm %s130_s1, 16 }
  0x24   :  { %p80_p13 = scmp.ne.s32.totalorder %s130_s1, %s79_s24  ;;  %p83_p0 = scmp.lt.u32.totalorder %s79_s24, %s130_s1 }
  0x26   :  { %p85_p1 = pnand %p83_p0, %p80_p13 }
  0x28   :  { %88 = shalt.err (!%p85_p1)
}
  0x29   :  { %35 = dma.vmem_to_hbm [thread:$0]  %s33_s20, 16, %s130_s1, [#allocation4]  }
  0x2a   :  { %91 = dma.done.wait [#allocation4], 16  }
  0x2b   :  { %92 = vsyncadd [#allocation4], 4294967280 }
  0x2c   :  { %39 = vsyncpa [#allocation3], 1 }
  0x2d   :  { %40 = vsyncpa [#allocation4], 1 }

</bundles_post_ra>
